<compile_context>
chip_gen: v5e
topology: v5e:2x2
jax: 0.10.0
libtpu: 0.0.40
codegen_flags: <defaults>
</compile_context>

<pallas_src>
import math

import jax
import jax.numpy as jnp
from jax import lax
from jax.experimental import pallas as pl
from jax.experimental.pallas import tpu as pltpu

ROW_TILE = 4096        # upper bound on the row tile (clamped per-N below)
_MIN_GRID_STEPS = 4    # keep >= 4 grid steps so v7x megacore gets >= 2 per TensorCore


def _mlp_kernel_folded(x_ref, w1_ref, w2_ref, w3_ref, b3_ref, o_ref):
    """Batch-on-lanes fused MLP; b1/b2 folded into the matmul K dimension."""
    tm = x_ref.shape[0]
    # Layer 1: x tile is row-major [TM, 8]; contract the last dims of both operands
    # so Mosaic performs the small per-tile relayout on the XLU (no HBM transpose).
    h1 = lax.dot_general(w1_ref[...], x_ref[...],
                         (((1,), (1,)), ((), ())),
                         preferred_element_type=jnp.float32)            # [128, TM] f32
    h1 = jnp.maximum(h1, 0.0).astype(w2_ref.dtype)                      # b1 already folded
    # Append a ones row (+7 zero rows) so W2' @ [h1; 1; 0...] adds b2 on the MXU.
    aug = (lax.broadcasted_iota(jnp.int32, (8, tm), 0) == 0).astype(w2_ref.dtype)
    h1a = jnp.concatenate([h1, aug], axis=0)                            # [136, TM] bf16
    h2 = jnp.dot(w2_ref[...], h1a, preferred_element_type=jnp.float32)  # [128, TM] f32
    h2 = jnp.maximum(h2, 0.0).astype(w3_ref.dtype)                      # b2 already folded
    out = jnp.dot(w3_ref[...], h2, preferred_element_type=jnp.float32)  # [1, TM] f32
    o_ref[...] = (out + b3_ref[0]).astype(o_ref.dtype)                  # lane-dense store


def _mlp_kernel_plain(x_ref, w1_ref, w2_ref, b2_ref, w3_ref, b3_ref, o_ref):
    """v5e-friendly variant: K stays <= 128 (single MXU pass); b2 added in f32,
    fused with the ReLU + cast so the [128, TM] intermediate is touched once."""
    h1 = lax.dot_general(w1_ref[...], x_ref[...],
                         (((1,), (1,)), ((), ())),
                         preferred_element_type=jnp.float32)            # [128, TM]
    h1 = jnp.maximum(h1, 0.0).astype(w2_ref.dtype)                      # b1 folded (free)
    h2 = jnp.dot(w2_ref[...], h1, preferred_element_type=jnp.float32)   # [128, TM]
    h2 = jnp.maximum(h2 + b2_ref[...], 0.0).astype(w3_ref.dtype)
    out = jnp.dot(w3_ref[...], h2, preferred_element_type=jnp.float32)  # [1, TM]
    o_ref[...] = (out + b3_ref[0]).astype(o_ref.dtype)


def value_network_forward(x, params, *, row_tile=ROW_TILE, fold_biases=True,
                          matmul_dtype=jnp.bfloat16):
    """Mirrors ValueNetwork.forward.

    x: float32 array with trailing feature dim 6 (any number of leading dims).
    params: (w1, b1, w2, b2, w3, b3); weights in PyTorch [out, in] layout, biases 1-D.
    fold_biases: True for v6e/v7x (256-deep MXU); set False on v5e.
    """
    if x.ndim == 6:   # mirrors the module's `if x.ndim == 6: x = x.unsqueeze(0)`
        x = x[None, ...]

    w1, b1, w2, b2, w3, b3 = params
    lead_shape = x.shape[:-1]
    n = math.prod(lead_shape) if lead_shape else 1
    if n == 0:        # zero-sized batch: nothing to compute
        return jnp.zeros(lead_shape + (1,), jnp.float32)

    # Clamp the tile: big enough to amortize per-step overhead, small enough that the
    # grid keeps >= _MIN_GRID_STEPS steps; always a multiple of 128.
    rt = min(row_tile, max(128, 128 * pl.cdiv(pl.cdiv(n, 128), _MIN_GRID_STEPS)))
    n_pad = pl.cdiv(n, rt) * rt

    # Row-major input, feature dim padded 6 -> 8 with a ones column at index 6 so b1
    # rides in W1's column 6 (column 7 is zero).  Cast + concat + pad fuse in XLA;
    # no HBM transpose pass.
    xf = x.reshape(n, 6).astype(matmul_dtype)
    x_aug = jnp.concatenate([xf, jnp.ones((n, 1), matmul_dtype)], axis=1)    # [n, 7]
    x_aug = jnp.pad(x_aug, ((0, n_pad - n), (0, 1)))                         # [n_pad, 8]

    w1_aug = jnp.concatenate(
        [w1, b1.reshape(128, 1), jnp.zeros((128, 1), w1.dtype)],
        axis=1).astype(matmul_dtype)                                         # [128, 8]
    w3c = w3.astype(matmul_dtype)                                            # [1, 128]
    b3s = b3.reshape(1).astype(jnp.float32)                                  # SMEM scalar

    grid = (n_pad // rt,)
    x_spec = pl.BlockSpec((rt, 8), lambda i: (i, 0))           # pipelined input tile
    out_spec = pl.BlockSpec((1, rt), lambda i: (0, i))         # lane-dense output tile
    res = lambda shape: pl.BlockSpec(shape, lambda i: (0, 0))  # resident weights
    smem = pl.BlockSpec(memory_space=pltpu.MemorySpace.SMEM)

    flops_row = 2 * (8 * 128 + (136 if fold_biases else 128) * 128 + 128)
    cost = pl.CostEstimate(flops=flops_row * n_pad, transcendentals=0,
                           bytes_accessed=20 * n_pad + 40_000)

    if fold_biases:
        # Fold b2 into W2 along K (K = 136 <= 256-deep MXU on v6e/v7x -> free row).
        w2_aug = jnp.concatenate(
            [w2, b2.reshape(128, 1), jnp.zeros((128, 7), w2.dtype)],
            axis=1).astype(matmul_dtype)                                     # [128, 136]
        kernel = _mlp_kernel_folded
        in_specs = [x_spec, res((128, 8)), res((128, 136)), res((1, 128)), smem]
        args = (x_aug, w1_aug, w2_aug, w3c, b3s)
    else:
        kernel = _mlp_kernel_plain
        in_specs = [x_spec, res((128, 8)), res((128, 128)), res((128, 1)),
                    res((1, 128)), smem]
        args = (x_aug, w1_aug, w2.astype(matmul_dtype),
                b2.reshape(128, 1).astype(jnp.float32), w3c, b3s)

    outT = pl.pallas_call(
        kernel,
        out_shape=jax.ShapeDtypeStruct((1, n_pad), jnp.float32),
        grid_spec=pltpu.PrefetchScalarGridSpec(
            num_scalar_prefetch=0,
            grid=grid,
            in_specs=in_specs,
            out_specs=out_spec,
        ),
        compiler_params=pltpu.CompilerParams(
            dimension_semantics=("parallel",),   # megacore sharding on v7x
        ),
        cost_estimate=cost,
    )(*args)

    out = outT[:, :n].T                                                      # [n, 1] f32
    return out.reshape(lead_shape + (1,))


def init_params(key):
    """Matches nn.Linear default init U(-1/sqrt(fan_in), +1/sqrt(fan_in)).
    Weights in PyTorch [out_features, in_features] layout; biases 1-D [out_features]."""
    ks = jax.random.split(key, 6)

    def lin(kw, kb, fan_in, fan_out):
        bound = 1.0 / math.sqrt(fan_in)
        w = jax.random.uniform(kw, (fan_out, fan_in), jnp.float32, -bound, bound)
        b = jax.random.uniform(kb, (fan_out,), jnp.float32, -bound, bound)
        return w, b

    w1, b1 = lin(ks[0], ks[1], 6, 128)
    w2, b2 = lin(ks[2], ks[3], 128, 128)
    w3, b3 = lin(ks[4], ks[5], 128, 1)
    return (w1, b1, w2, b2, w3, b3)


def _reference_forward(x, params, *, fold_biases=True, matmul_dtype=jnp.bfloat16):
    """Plain-JAX reference mirroring the kernel's bf16-input / f32-accumulate math."""
    if x.ndim == 6:
        x = x[None, ...]
    w1, b1, w2, b2, w3, b3 = params
    lead_shape = x.shape[:-1]
    n = math.prod(lead_shape) if lead_shape else 1
    cast = lambda a: a.astype(matmul_dtype)
    xr = cast(x.reshape(n, 6))
    b1e = cast(b1).astype(jnp.float32)[:, None]                    # kernel folds b1 as bf16
    b2e = (cast(b2) if fold_biases else b2).astype(jnp.float32)[:, None]
    h1 = jnp.maximum(
        lax.dot_general(cast(w1), xr, (((1,), (1,)), ((), ())),
                        preferred_element_type=jnp.float32) + b1e, 0.0)
    h2 = jnp.maximum(
        jnp.dot(cast(w2), cast(h1), preferred_element_type=jnp.float32) + b2e, 0.0)
    out = jnp.dot(cast(w3), cast(h2), preferred_element_type=jnp.float32) + b3[:, None]
    return out.T.reshape(lead_shape + (1,))


if __name__ == "__main__":
    key = jax.random.PRNGKey(0)
    pkey, xkey, xkey2 = jax.random.split(key, 3)
    params = init_params(pkey)

    # Small example: batch=2, seq=8 states of 6 features each.
    x = jax.random.normal(xkey, (2, 8, 6), dtype=jnp.float32)
    out = jax.block_until_ready(value_network_forward(x, params))
    ref = _reference_forward(x, params)
    assert out.shape == (2, 8, 1), out.shape
    assert jnp.allclose(out, ref, atol=2e-3, rtol=2e-3), float(jnp.max(jnp.abs(out - ref)))

    # Larger ragged shape exercising multiple grid tiles (2500 rows -> 4 x 640-row tiles).
    x2 = jax.random.normal(xkey2, (2500, 6), dtype=jnp.float32)
    out2 = jax.block_until_ready(value_network_forward(x2, params))
    ref2 = _reference_forward(x2, params)
    assert out2.shape == (2500, 1), out2.shape
    assert jnp.allclose(out2, ref2, atol=2e-3, rtol=2e-3), float(jnp.max(jnp.abs(out2 - ref2)))

    # v5e-friendly unfolded path (K <= 128, f32 bias add fused with ReLU).
    out3 = jax.block_until_ready(value_network_forward(x2, params, fold_biases=False))
    ref3 = _reference_forward(x2, params, fold_biases=False)
    assert jnp.allclose(out3, ref3, atol=2e-3, rtol=2e-3), float(jnp.max(jnp.abs(out3 - ref3)))

    print("KERNEL_OK")
</pallas_src>

<mosaic_0001>
module attributes {stable_mosaic.version = 11 : i64} {
  func.func @_mlp_kernel_folded(%arg0: i32, %arg1: memref<128x8xbf16, #tpu.memory_space<vmem>>, %arg2: memref<128x8xbf16, #tpu.memory_space<vmem>>, %arg3: memref<128x136xbf16, #tpu.memory_space<vmem>>, %arg4: memref<1x128xbf16, #tpu.memory_space<vmem>>, %arg5: memref<1xf32, #tpu.memory_space<smem>>, %arg6: memref<1x128xf32, #tpu.memory_space<vmem>>) attributes {dimension_semantics = [#tpu.dimension_semantics<parallel>], iteration_bounds = array<i64: 1>, scalar_prefetch = 0 : i64, scratch_operands = 0 : i64, tpu.core_type = #tpu.core_type<tc>, window_params = [{transform_indices = @transform_0, window_bounds = array<i64: 128, 8>}, {pipeline_mode = #tpu.pipeline_mode<synchronous>, transform_indices = @transform_1, window_bounds = array<i64: 128, 8>}, {pipeline_mode = #tpu.pipeline_mode<synchronous>, transform_indices = @transform_2, window_bounds = array<i64: 128, 136>}, {pipeline_mode = #tpu.pipeline_mode<synchronous>, transform_indices = @transform_3, window_bounds = array<i64: 1, 128>}, {transform_indices = @transform_4, window_bounds = array<i64: 1>}, {transform_indices = @transform_5, window_bounds = array<i64: 1, 128>}]} {
    %c0 = arith.constant 0 : index
    %c0_0 = arith.constant 0 : index
    %0 = vector.load %arg2[%c0, %c0_0] : memref<128x8xbf16, #tpu.memory_space<vmem>>, vector<128x8xbf16>
    %c0_1 = arith.constant 0 : index
    %c0_2 = arith.constant 0 : index
    %1 = vector.load %arg1[%c0_1, %c0_2] : memref<128x8xbf16, #tpu.memory_space<vmem>>, vector<128x8xbf16>
    %cst = arith.constant dense<0.000000e+00> : vector<128x128xf32>
    %2 = tpu.matmul %0, %1, %cst {dimension_numbers = #tpu.dot_dimension_numbers<[1], [1], [0], [0], [0, 0, 1, 0], [], []>} : vector<128x8xbf16>, vector<128x8xbf16>, vector<128x128xf32> -> vector<128x128xf32>
    %cst_3 = arith.constant 0.000000e+00 : f32
    %3 = vector.broadcast %cst_3 : f32 to vector<128x128xf32>
    %4 = arith.maximumf %2, %3 : vector<128x128xf32>
    %5 = arith.truncf %4 : vector<128x128xf32> to vector<128x128xbf16>
    %6 = tpu.iota {dimensions = array<i32: 0>} : vector<8x128xi32>
    %c0_i32 = arith.constant 0 : i32
    %7 = vector.broadcast %c0_i32 : i32 to vector<8x128xi32>
    %8 = arith.cmpi eq, %6, %7 : vector<8x128xi32>
    %9 = arith.extui %8 : vector<8x128xi1> to vector<8x128xi32>
    %10 = arith.sitofp %9 : vector<8x128xi32> to vector<8x128xf32>
    %11 = arith.truncf %10 : vector<8x128xf32> to vector<8x128xbf16>
    %12 = tpu.concatenate %5, %11 in 0 : vector<128x128xbf16>, vector<8x128xbf16> -> vector<136x128xbf16>
    %c0_4 = arith.constant 0 : index
    %c0_5 = arith.constant 0 : index
    %13 = vector.load %arg3[%c0_4, %c0_5] : memref<128x136xbf16, #tpu.memory_space<vmem>>, vector<128x136xbf16>
    %cst_6 = arith.constant dense<0.000000e+00> : vector<128x128xf32>
    %14 = tpu.matmul %13, %12, %cst_6 {dimension_numbers = #tpu.dot_dimension_numbers<[1], [0], [0], [1], [0, 0, 1, 1], [], []>} : vector<128x136xbf16>, vector<136x128xbf16>, vector<128x128xf32> -> vector<128x128xf32>
    %cst_7 = arith.constant 0.000000e+00 : f32
    %15 = vector.broadcast %cst_7 : f32 to vector<128x128xf32>
    %16 = arith.maximumf %14, %15 : vector<128x128xf32>
    %17 = arith.truncf %16 : vector<128x128xf32> to vector<128x128xbf16>
    %c0_8 = arith.constant 0 : index
    %c0_9 = arith.constant 0 : index
    %18 = vector.load %arg4[%c0_8, %c0_9] : memref<1x128xbf16, #tpu.memory_space<vmem>>, vector<1x128xbf16>
    %cst_10 = arith.constant dense<0.000000e+00> : vector<1x128xf32>
    %19 = tpu.matmul %18, %17, %cst_10 {dimension_numbers = #tpu.dot_dimension_numbers<[1], [0], [0], [1], [0, 0, 1, 1], [], []>} : vector<1x128xbf16>, vector<128x128xbf16>, vector<1x128xf32> -> vector<1x128xf32>
    %c0_11 = arith.constant 0 : index
    %20 = memref.load %arg5[%c0_11] : memref<1xf32, #tpu.memory_space<smem>>
    %21 = vector.broadcast %20 : f32 to vector<1x128xf32>
    %22 = arith.addf %19, %21 : vector<1x128xf32>
    %c0_12 = arith.constant 0 : index
    %c0_13 = arith.constant 0 : index
    %23 = vector.load %arg6[%c0_12, %c0_13] : memref<1x128xf32, #tpu.memory_space<vmem>>, vector<1x128xf32>
    tpu.vector_store %arg6[%c0_12, %c0_13], %22 {strides = array<i32>} : memref<1x128xf32, #tpu.memory_space<vmem>>, vector<1x128xf32>,
    return
  }
  func.func @transform_0(%arg0: i32) -> (i32, i32) {
    %c0_i32 = arith.constant 0 : i32
    %c0_i32_0 = arith.constant 0 : i32
    return %arg0, %c0_i32 : i32, i32
  }
  func.func @transform_1(%arg0: i32) -> (i32, i32) {
    %c0_i32 = arith.constant 0 : i32
    %c0_i32_0 = arith.constant 0 : i32
    %c0_i32_1 = arith.constant 0 : i32
    return %c0_i32, %c0_i32_0 : i32, i32
  }
  func.func @transform_2(%arg0: i32) -> (i32, i32) {
    %c0_i32 = arith.constant 0 : i32
    %c0_i32_0 = arith.constant 0 : i32
    %c0_i32_1 = arith.constant 0 : i32
    return %c0_i32, %c0_i32_0 : i32, i32
  }
  func.func @transform_3(%arg0: i32) -> (i32, i32) {
    %c0_i32 = arith.constant 0 : i32
    %c0_i32_0 = arith.constant 0 : i32
    %c0_i32_1 = arith.constant 0 : i32
    return %c0_i32, %c0_i32_0 : i32, i32
  }
  func.func @transform_4(%arg0: i32) -> i32 {
    %c0_i32 = arith.constant 0 : i32
    %c0_i32_0 = arith.constant 0 : i32
    return %c0_i32 : i32
  }
  func.func @transform_5(%arg0: i32) -> (i32, i32) {
    %c0_i32 = arith.constant 0 : i32
    %c0_i32_0 = arith.constant 0 : i32
    return %c0_i32, %arg0 : i32, i32
  }
}

</mosaic_0001>

<bundles_post_ra>
// kernel: tpu_custom_call.1
= control target key start
LH: loop header
LB: loop body
LE: loop exit
PB: predicated region body
PF: predicated region fallthrough
CT: control target
= control target key end

     0   :  { %vm135_vm0 = vcmask 64512   ;;  %s1027_s0 = inlined_call_operand.vmem [shape: bf16[128,8], index: 0, kind: input, shape index: {}]   ;;  %s1028_s1 = inlined_call_operand.vmem [shape: bf16[128,8], index: 1, kind: input, shape index: {}]   ;;  %s1029_s2 = inlined_call_operand.vmem [shape: bf16[128,136], index: 2, kind: input, shape index: {}]   ;;  %s1030_s3 = inlined_call_operand.vmem [shape: bf16[1,128], index: 3, kind: input, shape index: {}]   ;;  %s1031_s4 = inlined_call_operand.<no memory space> [shape: f32[1], index: 4, kind: input, shape index: {}]   ;;  %s1032_s5 = inlined_call_operand.hbm [shape: f32[1,128], index: 5, kind: output, shape index: {}]  }
   0x1   :  { %v750_v0 = vld [vmem:[%s1027_s0 + $0x38] sm:$0xff] }
   0x2   :  { %11 = vsyncpa [#allocation4], 0  ;;  %v182_v1 = vsel %vm135_vm0, %v750_v0, 0  ;;  %v749_v2 = vld [vmem:[%s1027_s0 + $0x30] sm:$0xff]  ;;  %v748_v4 = vld [vmem:[%s1027_s0 + $0x28] sm:$0xff]  ;;  %v265_v43 = vlaneseq  ;;  %v803_v50 = vmov 0.0  }
   0x3   :  { %184 = vmatpush.bf16.xpose.msra.mxu0 %v182_v1  ;;  %767 = vmatpush.bf16.xpose.msra.mxu3 %v182_v1  ;;  %v179_v3 = vsel %vm135_vm0, %v749_v2, 0  ;;  %v176_v5 = vsel %vm135_vm0, %v748_v4, 0  ;;  %v747_v6 = vld [vmem:[%s1027_s0 + $0x20] sm:$0xff]  ;;  %v746_v8 = vld [vmem:[%s1027_s0 + $0x18] sm:$0xff]  ;;  %v745_v10 = vld [vmem:[%s1027_s0 + $0x10] sm:$0xff]  ;;  %vm431_vm2 = vcmask 1043456  }
   0x4   :  { %v173_v7 = vsel %vm135_vm0, %v747_v6, 0  ;;  %v170_v9 = vsel %vm135_vm0, %v746_v8, 0  ;;  %v167_v11 = vsel %vm135_vm0, %v745_v10, 0  ;;  %v744_v12 = vld [vmem:[%s1027_s0 + $0x8] sm:$0xff]  ;;  %v743_v14 = vld [vmem:[%s1027_s0] sm:$0xff]  ;;  %v741_v19 = vld [vmem:[%s1028_s1 + $0x30] sm:$0xff] }
   0x5   :  { %v164_v13 = vsel %vm135_vm0, %v744_v12, 0  ;;  %v161_v15 = vsel %vm135_vm0, %v743_v14, 0  ;;  %v735_v16 = vld [vmem:[%s1028_s1] sm:$0xff]  ;;  %v740_v17 = vld [vmem:[%s1028_s1 + $0x28] sm:$0xff]  ;;  %v737_v20 = vld [vmem:[%s1028_s1 + $0x10] sm:$0xff]  ;;  %v266_v45 = vshrl.u32 %v265_v43, 7 }
   0x6   :  { %v736_v18 = vld [vmem:[%s1028_s1 + $0x8] sm:$0xff]  ;;  %v742_v21 = vld [vmem:[%s1028_s1 + $0x38] sm:$0xff]  ;;  %v739_v23 = vld [vmem:[%s1028_s1 + $0x20] sm:$0xff]  ;;  %s804_s11 = smov [#allocation3]   ;;  %s581_s0 = sshll.u32 %s1032_s5, 4  ;;  %s582_s0 = int_to_ptr.hbm [resolvable:$true] %s581_s0 }
   0x7   :  { %v738_v22 = vld [vmem:[%s1028_s1 + $0x18] sm:$0xff]  ;;  %vm267_vm1 = vcmp.eq.s32.totalorder %v266_v45, 0  ;;  %v751_v62 = vld [vmem:[%s1029_s2 + $0x4] sm:$0xf]  ;;  %v667_v63 = vld [vmem:[%s1029_s2 + $0x8] sm:$0xf0] }
   0x8   :  { %v662_v51 = vsel %vm267_vm1, 1.0, %v803_v50  ;;  %v670_v1 = vor.u32 %v751_v62, %v667_v63  ;;  %v753_v12 = vld [vmem:[%s1029_s2 + $0x14] sm:$0xf]  ;;  %v707_v63 = vld [vmem:[%s1029_s2 + $0x58] sm:$0xf0]  ;;  %s579_s12 = sshll.u32 %s804_s11, 4  ;;  %s580_s12 = int_to_ptr.vmem [resolvable:$true] %s579_s12 }
   0x9   :  { %v270_v56 = vpack.c.bf16 %v662_v51, %v662_v51  ;;  %v757_v51 = vld [vmem:[%s1029_s2 + $0x34] sm:$0xf] }
   0xa   :  { %v761_v62 = vld [vmem:[%s1029_s2 + $0x54] sm:$0xf] }
   0xb   :  { %185 = vmatpush.bf16.xpose.msra.mxu0 %v179_v3  ;;  %768 = vmatpush.bf16.xpose.msra.mxu3 %v179_v3  ;;  %v433_v60 = vsel %vm431_vm2, %v270_v56, 0  ;;  %v759_v56 = vld [vmem:[%s1029_s2 + $0x44] sm:$0xf] }
   0xc   :  { %491 = vmatpush.bf16.msra.mxu2 %v433_v60  ;;  %v756_v60 = vld [vmem:[%s1029_s2 + $0x24] sm:$0xf0] }
   0xf   :  { %727 = vmatmul.msk.bf16.vlgmr.msra.gmra.mxu2 %vm135_vm0, %v670_v1  ;;  %v689_v1 = vld [vmem:[%s1029_s2 + $0x30] sm:$0xf] }
  0x13   :  { %186 = vmatpush.bf16.xpose.msra.mxu0 %v176_v5  ;;  %769 = vmatpush.bf16.xpose.msra.mxu3 %v176_v5 }
  0x1b   :  { %187 = vmatpush.bf16.xpose.msra.mxu0 %v173_v7  ;;  %770 = vmatpush.bf16.xpose.msra.mxu3 %v173_v7 }
  0x23   :  { %188 = vmatpush.bf16.xpose.msra.mxu0 %v170_v9  ;;  %771 = vmatpush.bf16.xpose.msra.mxu3 %v170_v9 }
  0x2b   :  { %189 = vmatpush.bf16.xpose.msra.mxu0 %v167_v11  ;;  %772 = vmatpush.bf16.xpose.msra.mxu3 %v167_v11 }
  0x33   :  { %190 = vmatpush.bf16.xpose.msra.mxu0 %v164_v13  ;;  %773 = vmatpush.bf16.xpose.msra.mxu3 %v164_v13  ;;  %v675_v13 = vld [vmem:[%s1029_s2 + $0x18] sm:$0xf0] }
  0x34   :  { %v678_v14 = vor.u32 %v753_v12, %v675_v13  ;;  %v705_v13 = vld [vmem:[%s1029_s2 + $0x50] sm:$0xf] }
  0x36   :  { %728 = vmatmul.msk.bf16.gmra.mxu2 %vm135_vm0, %v678_v14  ;;  %v762_v14 = vld [vmem:[%s1029_s2 + $0x54] sm:$0xf0] }
  0x3b   :  { %191 = vmatpush.bf16.xpose.msra.mxu0 %v161_v15  ;;  %774 = vmatpush.bf16.xpose.msra.mxu3 %v161_v15 }
  0x42   :  { %654 = vmatmul.msk.bf16.vlgmr.msra.gmra.mxu0 %vm135_vm0, %v735_v16  ;;  %659 = vmatmul.msk.bf16.vlgmr.msra.gmra.mxu3 %vm135_vm0, %v740_v17 }
  0x52   :  { %655 = vmatmul.msk.bf16.gmra.mxu0 %vm135_vm0, %v736_v18  ;;  %660 = vmatmul.msk.bf16.gmra.mxu3 %vm135_vm0, %v741_v19 }
  0x62   :  { %656 = vmatmul.msk.bf16.gmra.mxu0 %vm135_vm0, %v737_v20  ;;  %661 = vmatmul.msk.bf16.gmra.mxu3 %vm135_vm0, %v742_v21 }
  0x72   :  { %657 = vmatmul.msk.bf16.gmra.mxu0 %vm135_vm0, %v738_v22 }
  0x82   :  { %658 = vmatmul.msk.bf16.gmra.mxu0 %vm135_vm0, %v739_v23 }
  0xbf   :  { %v193_v24 = vpop.f32.mrf.mxu0 }
  0xc0   :  { %v233_v25 = vmax.f32 %v193_v24, 0.0 }
  0xc2   :  { %v249_v28 = vpack.c.bf16 %v233_v25, %v233_v25 }
  0xc4   :  { %v287_v31 = vunpack.c.l.b16 %v249_v28 }
  0xc5   :  { %v218_v26 = vpop.f32.mrf.mxu3 }
  0xc6   :  { %v243_v52 = vmax.f32 %v218_v26, 0.0 }
  0xc7   :  { %v195_v27 = vpop.f32.mrf.mxu0 }
  0xc8   :  { %v234_v29 = vmax.f32 %v195_v27, 0.0  ;;  %v259_v0 = vpack.c.bf16 %v243_v52, %v243_v52  ;;  %v691_v52 = vld [vmem:[%s1029_s2 + $0x38] sm:$0xf0] }
  0xca   :  { %v250_v30 = vpack.c.bf16 %v234_v29, %v234_v29  ;;  %v297_v7 = vunpack.c.l.b16 %v259_v0  ;;  %v710_v0 = vor.u32 %v761_v62, %v707_v63 }
  0xcc   :  { %v288_v32 = vunpack.c.l.b16 %v250_v30 }
  0xcd   :  { %v220_v33 = vpop.f32.mrf.mxu3 }
  0xce   :  { %v899_v34 = vpack.c.b16 %v288_v32, %v287_v31  ;;  %v244_v53 = vmax.f32 %v220_v33, 0.0 }
  0xcf   :  { %v901_v35 = vpop.f32.mrf.mxu0 }
  0xd0   :  { %v260_v2 = vpack.c.bf16 %v244_v53, %v244_v53  ;;  %v235_v32 = vmax.f32 %v901_v35, 0.0  ;;  %v694_v53 = vor.u32 %v757_v51, %v691_v52 }
  0xd2   :  { %v298_v8 = vunpack.c.l.b16 %v260_v2  ;;  %v251_v43 = vpack.c.bf16 %v235_v32, %v235_v32  ;;  %v758_v2 = vld [vmem:[%s1029_s2 + $0x34] sm:$0xf0] }
  0xd4   :  { %v308_v10 = vpack.c.b16 %v298_v8, %v297_v7  ;;  %v697_v7 = vld [vmem:[%s1029_s2 + $0x40] sm:$0xf]  ;;  %v760_v8 = vld [vmem:[%s1029_s2 + $0x44] sm:$0xf0] }
  0xd5   :  { %v223_v36 = vpop.f32.mrf.mxu3 }
  0xd6   :  { %v245_v44 = vmax.f32 %v223_v36, 0.0 }
  0xd7   :  { %v903_v37 = vpop.f32.mrf.mxu0 }
  0xd8   :  { %v261_v54 = vpack.c.bf16 %v245_v44, %v245_v44  ;;  %v236_v28 = vmax.f32 %v903_v37, 0.0 }
  0xda   :  { %v299_v3 = vunpack.c.l.b16 %v261_v54  ;;  %v673_v54 = vld [vmem:[%s1029_s2 + $0x10] sm:$0xf] }
  0xdd   :  { %v225_v38 = vpop.f32.mrf.mxu3 }
  0xde   :  { %v246_v46 = vmax.f32 %v225_v38, 0.0  ;;  %v252_v38 = vpack.c.bf16 %v236_v28, %v236_v28 }
  0xdf   :  { %v905_v39 = vpop.f32.mrf.mxu0 }
  0xe0   :  { %v262_v57 = vpack.c.bf16 %v246_v46, %v246_v46  ;;  %v237_v24 = vmax.f32 %v905_v39, 0.0  ;;  %v755_v39 = vld [vmem:[%s1029_s2 + $0x24] sm:$0xf]  ;;  %v290_v35 = vunpack.c.l.b16 %v252_v38  ;;  %v289_v46 = vunpack.c.l.b16 %v251_v43 }
  0xe2   :  { %v300_v4 = vunpack.c.l.b16 %v262_v57  ;;  %v253_v33 = vpack.c.bf16 %v237_v24, %v237_v24  ;;  %v699_v57 = vld [vmem:[%s1029_s2 + $0x48] sm:$0xf0] }
  0xe4   :  { %v309_v9 = vpack.c.b16 %v300_v4, %v299_v3  ;;  %v291_v44 = vunpack.c.l.b16 %v253_v33  ;;  %v690_v3 = vor.u32 %v758_v2, %v689_v1  ;;  %v763_v4 = vld [vmem:[%s1029_s2 + $0x64] sm:$0xf] }
  0xe5   :  { %v228_v40 = vpop.f32.mrf.mxu3 }
  0xe6   :  { %v247_v42 = vmax.f32 %v228_v40, 0.0 }
  0xe7   :  { %v205_v41 = vpop.f32.mrf.mxu0 }
  0xe8   :  { %v263_v47 = vpack.c.bf16 %v247_v42, %v247_v42  ;;  %v238_v21 = vmax.f32 %v205_v41, 0.0  ;;  %v683_v42 = vld [vmem:[%s1029_s2 + $0x28] sm:$0xf0] }
  0xe9   :  { %v686_v37 = vor.u32 %v755_v39, %v683_v42 }
  0xea   :  { %v301_v58 = vunpack.c.l.b16 %v263_v47  ;;  %v254_v29 = vpack.c.bf16 %v238_v21, %v238_v21  ;;  %v304_v47 = vpack.c.b16 %v290_v35, %v289_v46  ;;  %v766_v21 = vld [vmem:[%s1029_s2 + $0x74] sm:$0xf0] }
  0xeb   :  { %729 = vmatmul.msk.bf16.gmra.mxu2 %vm135_vm0, %v686_v37 }
  0xec   :  { %v292_v40 = vunpack.c.l.b16 %v254_v29 }
  0xed   :  { %v230_v48 = vpop.f32.mrf.mxu3 }
  0xee   :  { %v248_v49 = vmax.f32 %v230_v48, 0.0  ;;  %v305_v45 = vpack.c.b16 %v292_v40, %v291_v44  ;;  %v665_v48 = vld [vmem:[%s1029_s2] sm:$0xf] }
  0xef   :  { %v208_v55 = vpop.f32.mrf.mxu0 }
  0xf0   :  { %v264_v59 = vpack.c.bf16 %v248_v49, %v248_v49  ;;  %v239_v18 = vmax.f32 %v208_v55, 0.0  ;;  %v752_v49 = vld [vmem:[%s1029_s2 + $0x4] sm:$0xf0] }
  0xf1   :  { %v666_v50 = vor.u32 %v752_v49, %v665_v48 }
  0xf2   :  { %v302_v61 = vunpack.c.l.b16 %v264_v59  ;;  %v255_v25 = vpack.c.bf16 %v239_v18, %v239_v18  ;;  %v681_v59 = vld [vmem:[%s1029_s2 + $0x20] sm:$0xf] }
  0xf4   :  { %v310_v5 = vpack.c.b16 %v302_v61, %v301_v58  ;;  %v293_v36 = vunpack.c.l.b16 %v255_v25  ;;  %v702_v58 = vor.u32 %v759_v56, %v699_v57  ;;  %v682_v61 = vor.u32 %v756_v60, %v681_v59 }
  0xf6   :  { %435 = vmatpush.bf16.msra.mxu1 %v310_v5  ;;  %v715_v5 = vld [vmem:[%s1029_s2 + $0x68] sm:$0xf0] }
  0xf7   :  { %v210_v6 = vpop.f32.mrf.mxu0 }
  0xf8   :  { %v240_v16 = vmax.f32 %v210_v6, 0.0  ;;  %v718_v6 = vor.u32 %v763_v4, %v715_v5 }
  0xfa   :  { %436 = vmatpush.bf16.msra.mxu1 %v309_v9  ;;  %v256_v22 = vpack.c.bf16 %v240_v16, %v240_v16  ;;  %v698_v9 = vor.u32 %v760_v8, %v697_v7  ;;  %v713_v16 = vld [vmem:[%s1029_s2 + $0x60] sm:$0xf] }
  0xfb   :  { %730 = vmatmul.msk.bf16.gmra.mxu2 %vm135_vm0, %v694_v53 }
  0xfc   :  { %v294_v30 = vunpack.c.l.b16 %v256_v22 }
  0xfe   :  { %437 = vmatpush.bf16.msra.mxu1 %v308_v10  ;;  %v306_v41 = vpack.c.b16 %v294_v30, %v293_v36  ;;  %v765_v10 = vld [vmem:[%s1029_s2 + $0x74] sm:$0xf] }
  0xff   :  { %v213_v11 = vpop.f32.mrf.mxu0 }
 0x100   :  { %v241_v15 = vmax.f32 %v213_v11, 0.0  ;;  %v723_v11 = vld [vmem:[%s1029_s2 + $0x78] sm:$0xf0] }
 0x101   :  { %v726_v12 = vor.u32 %v765_v10, %v723_v11 }
 0x102   :  { %v257_v19 = vpack.c.bf16 %v241_v15, %v241_v15  ;;  %v706_v15 = vor.u32 %v762_v14, %v705_v13 }
 0x104   :  { %v295_v26 = vunpack.c.l.b16 %v257_v19  ;;  %v493_v19 = vpop.f32.mrf.mxu2 }
 0x107   :  { %v215_v17 = vpop.f32.mrf.mxu0 }
 0x108   :  { %v242_v20 = vmax.f32 %v215_v17, 0.0  ;;  %v764_v17 = vld [vmem:[%s1029_s2 + $0x64] sm:$0xf0] }
 0x109   :  { %v714_v18 = vor.u32 %v764_v17, %v713_v16 }
 0x10a   :  { %v258_v23 = vpack.c.bf16 %v242_v20, %v242_v20  ;;  %v721_v20 = vld [vmem:[%s1029_s2 + $0x70] sm:$0xf] }
 0x10b   :  { %731 = vmatmul.msk.bf16.gmra.mxu2 %vm135_vm0, %v702_v58 }
 0x10c   :  { %v296_v27 = vunpack.c.l.b16 %v258_v23  ;;  %v495_v22 = vpop.f32.mrf.mxu2  ;;  %v722_v23 = vor.u32 %v766_v21, %v721_v20 }
 0x10e   :  { %v307_v31 = vpack.c.b16 %v296_v27, %v295_v26 }
 0x110   :  { %438 = vmatpush.bf16.msra.mxu1 %v307_v31 }
 0x114   :  { %439 = vmatpush.bf16.msra.mxu1 %v306_v41  ;;  %v498_v24 = vpop.f32.mrf.mxu2 }
 0x118   :  { %440 = vmatpush.bf16.msra.mxu1 %v305_v45 }
 0x11b   :  { %732 = vmatmul.msk.bf16.gmra.mxu2 %vm135_vm0, %v710_v0 }
 0x11c   :  { %441 = vmatpush.bf16.msra.mxu1 %v304_v47  ;;  %v500_v26 = vpop.f32.mrf.mxu2 }
 0x120   :  { %442 = vmatpush.bf16.msra.mxu1 %v899_v34  ;;  %v754_v34 = vld [vmem:[%s1029_s2 + $0x14] sm:$0xf0] }
 0x121   :  { %v674_v55 = vor.u32 %v754_v34, %v673_v54 }
 0x123   :  { %443 = vmatmul.bf16.vlgmr.msra.gmra.mxu1 %v666_v50 }
 0x12b   :  { %733 = vmatmul.msk.bf16.gmra.mxu2 %vm135_vm0, %v718_v6 }
 0x133   :  { %448 = vmatmul.bf16.gmra.mxu1 %v674_v55 }
 0x13b   :  { %734 = vmatmul.msk.bf16.gmra.mxu2 %vm135_vm0, %v726_v12 }
 0x143   :  { %453 = vmatmul.bf16.gmra.mxu1 %v682_v61 }
 0x153   :  { %458 = vmatmul.bf16.gmra.mxu1 %v690_v3 }
 0x163   :  { %463 = vmatmul.bf16.gmra.mxu1 %v698_v9 }
 0x16e   :  { %v503_v30 = vpop.f32.mrf.mxu2 }
 0x173   :  { %468 = vmatmul.bf16.gmra.mxu1 %v706_v15 }
 0x176   :  { %v505_v40 = vpop.f32.mrf.mxu2 }
 0x17e   :  { %v508_v44 = vpop.f32.mrf.mxu2 }
 0x183   :  { %473 = vmatmul.bf16.gmra.mxu1 %v714_v18 }
 0x186   :  { %v510_v47 = vpop.f32.mrf.mxu2 }
 0x18e   :  { %v513_v54 = vpop.f32.mrf.mxu2 }
 0x193   :  { %478 = vmatmul.bf16.gmra.mxu1 %v722_v23 }
 0x196   :  { %v515_v58 = vpop.f32.mrf.mxu2 }
 0x19e   :  { %v518_v62 = vpop.f32.mrf.mxu2 }
 0x1a0   :  { %v444_v25 = vpop.f32.mrf.mxu1 }
 0x1a1   :  { %v494_v27 = vadd.f32 %v493_v19, %v444_v25 }
 0x1a3   :  { %v533_v31 = vmax.f32 %v494_v27, 0.0 }
 0x1a6   :  { %v520_v1 = vpop.f32.mrf.mxu2 }
 0x1a8   :  { %v446_v28 = vpop.f32.mrf.mxu1 }
 0x1a9   :  { %v496_v29 = vadd.f32 %v495_v22, %v446_v28 }
 0x1ab   :  { %v534_v32 = vmax.f32 %v496_v29, 0.0 }
 0x1ad   :  { %v1015_v33 = vpack.c.bf16 %v534_v32, %v533_v31  ;;  %v559_v31 = vstv %s1031_s4 }
 0x1ae   :  { %v523_v3 = vpop.f32.mrf.mxu2 }
 0x1b0   :  { %v449_v36 = vpop.f32.mrf.mxu1 }
 0x1b1   :  { %v499_v38 = vadd.f32 %v498_v24, %v449_v36 }
 0x1b3   :  { %v535_v42 = vmax.f32 %v499_v38, 0.0 }
 0x1b6   :  { %v525_v5 = vpop.f32.mrf.mxu2 }
 0x1b8   :  { %v451_v41 = vpop.f32.mrf.mxu1 }
 0x1b9   :  { %v501_v39 = vadd.f32 %v500_v26, %v451_v41 }
 0x1bb   :  { %v536_v37 = vmax.f32 %v501_v39, 0.0 }
 0x1bd   :  { %v550_v43 = vpack.c.bf16 %v536_v37, %v535_v42 }
 0x1be   :  { %v528_v7 = vpop.f32.mrf.mxu2 }
 0x1c0   :  { %v454_v35 = vpop.f32.mrf.mxu1 }
 0x1c1   :  { %v504_v45 = vadd.f32 %v503_v30, %v454_v35  ;;  %v557_v30 = vld [vmem:[%s1030_s3] sm:$0x1] }
 0x1c3   :  { %v537_v49 = vmax.f32 %v504_v45, 0.0 }
 0x1c6   :  { %v530_v10 = vpop.f32.mrf.mxu2 }
 0x1c8   :  { %v456_v46 = vpop.f32.mrf.mxu1 }
 0x1c9   :  { %v506_v48 = vadd.f32 %v505_v40, %v456_v46 }
 0x1cb   :  { %v538_v50 = vmax.f32 %v506_v48, 0.0 }
 0x1cd   :  { %v551_v51 = vpack.c.bf16 %v538_v50, %v537_v49 }
 0x1d0   :  { %v459_v52 = vpop.f32.mrf.mxu1 }
 0x1d1   :  { %v509_v53 = vadd.f32 %v508_v44, %v459_v52 }
 0x1d3   :  { %v539_v56 = vmax.f32 %v509_v53, 0.0 }
 0x1d8   :  { %v461_v34 = vpop.f32.mrf.mxu1 }
 0x1d9   :  { %v511_v55 = vadd.f32 %v510_v47, %v461_v34 }
 0x1db   :  { %v540_v57 = vmax.f32 %v511_v55, 0.0 }
 0x1dd   :  { %v552_v59 = vpack.c.bf16 %v540_v57, %v539_v56 }
 0x1e0   :  { %v464_v60 = vpop.f32.mrf.mxu1 }
 0x1e1   :  { %v514_v61 = vadd.f32 %v513_v54, %v464_v60 }
 0x1e3   :  { %v541_v28 = vmax.f32 %v514_v61, 0.0 }
 0x1e8   :  { %v466_v63 = vpop.f32.mrf.mxu1 }
 0x1e9   :  { %v516_v22 = vadd.f32 %v515_v58, %v466_v63 }
 0x1eb   :  { %v542_v26 = vmax.f32 %v516_v22, 0.0 }
 0x1ed   :  { %v553_v29 = vpack.c.bf16 %v542_v26, %v541_v28 }
 0x1f0   :  { %v469_v0 = vpop.f32.mrf.mxu1 }
 0x1f1   :  { %v519_v20 = vadd.f32 %v518_v62, %v469_v0 }
 0x1f3   :  { %v543_v25 = vmax.f32 %v519_v20, 0.0 }
 0x1f8   :  { %v471_v2 = vpop.f32.mrf.mxu1 }
 0x1f9   :  { %v521_v17 = vadd.f32 %v520_v1, %v471_v2 }
 0x1fb   :  { %v544_v23 = vmax.f32 %v521_v17, 0.0 }
 0x1fd   :  { %v554_v27 = vpack.c.bf16 %v544_v23, %v543_v25 }
 0x200   :  { %v474_v4 = vpop.f32.mrf.mxu1 }
 0x201   :  { %v524_v14 = vadd.f32 %v523_v3, %v474_v4 }
 0x203   :  { %v545_v21 = vmax.f32 %v524_v14, 0.0 }
 0x208   :  { %v476_v6 = vpop.f32.mrf.mxu1 }
 0x209   :  { %v526_v12 = vadd.f32 %v525_v5, %v476_v6 }
 0x20b   :  { %v546_v18 = vmax.f32 %v526_v12, 0.0 }
 0x20d   :  { %v555_v24 = vpack.c.bf16 %v546_v18, %v545_v21 }
 0x210   :  { %v479_v8 = vpop.f32.mrf.mxu1 }
 0x211   :  { %v529_v9 = vadd.f32 %v528_v7, %v479_v8 }
 0x213   :  { %v547_v15 = vmax.f32 %v529_v9, 0.0 }
 0x218   :  { %v481_v11 = vpop.f32.mrf.mxu1 }
 0x219   :  { %v531_v13 = vadd.f32 %v530_v10, %v481_v11 }
 0x21b   :  { %v548_v16 = vmax.f32 %v531_v13, 0.0 }
 0x21d   :  { %v556_v19 = vpack.c.bf16 %v548_v16, %v547_v15 }
 0x21f   :  { %560 = vmatpush.bf16.msrb.mxu3 %v556_v19 }
 0x223   :  { %561 = vmatpush.bf16.msrb.mxu3 %v555_v24 }
 0x227   :  { %562 = vmatpush.bf16.msrb.mxu3 %v554_v27 }
 0x22b   :  { %563 = vmatpush.bf16.msrb.mxu3 %v553_v29 }
 0x22f   :  { %564 = vmatpush.bf16.msrb.mxu3 %v552_v59 }
 0x233   :  { %565 = vmatpush.bf16.msrb.mxu3 %v551_v51 }
 0x237   :  { %566 = vmatpush.bf16.msrb.mxu3 %v550_v43 }
 0x23b   :  { %567 = vmatpush.bf16.msrb.mxu3 %v1015_v33 }
 0x23e   :  { %568 = vmatmul.bf16.vlgmr.msrb.gmra.mxu3 %v557_v30 }
 0x2c1   :  { %v569_v32 = vpop.f32.mrf.mxu3 }
 0x2c2   :  { %v570_v36 = vadd.f32 %v569_v32, %v559_v31 }
 0x2c4   :  { %573 = vst [vmem:[#allocation3] sm:$0x1] %v570_v36 }
 0x2c5   :  { %584 = dma.vmem_to_hbm [thread:$0]  %s580_s12, 16, %s582_s0, [#allocation4]  }
 0x2c9   :  { %v571_v33 = vpop.f32.mrf.mxu3 }
 0x2ca   :  { %801 = dma.done.wait [#allocation4], 16  }
 0x2cb   :  { %802 = vsyncadd [#allocation4], 4294967280 }
 0x2cc   :  { %589 = vsyncpa [#allocation4], 1 }

</bundles_post_ra>
